<compile_context>
chip_gen: v7x
topology: tpu7x:2x2x1
jax: 0.10.0
libtpu: 0.0.40
codegen_flags: <defaults>
</compile_context>

<pallas_src>
import functools
import math

import jax
import jax.numpy as jnp
from jax.experimental import pallas as pl
from jax.experimental.pallas import tpu as pltpu


def _vmem_limit_bytes():
    """Generation-aware VMEM limit: ~65% of physical capacity
    (~83 MiB on v5e/v6e's 128 MiB, ~41 MiB on v7x's 64 MiB)."""
    try:
        cap = getattr(pltpu.get_tpu_info(), "vmem_capacity_bytes", None)
        if cap:
            return int(cap * 0.65)
    except Exception:
        pass
    return 48 * 1024 * 1024


def _compiler_params(sem):
    return pltpu.CompilerParams(dimension_semantics=sem,
                                vmem_limit_bytes=_vmem_limit_bytes())


def _pick_tile(dim, desired, align):
    """Largest power-of-two tile <= desired that divides dim and is a multiple of
    `align`; falls back to the full dim (full-extent blocks are always legal)."""
    t = desired
    while t >= align:
        if dim % t == 0:
            return t
        t //= 2
    return dim


# ---------------------------------------------------------------------------
# 1) Tiled matmul + bias  (QKV in-projection)
# ---------------------------------------------------------------------------
def _matmul_bias_kernel(x_ref, w_ref, b_ref, o_ref, acc_ref):
    k = pl.program_id(2)

    @pl.when(k == 0)
    def _():
        acc_ref[...] = jnp.zeros_like(acc_ref)

    acc_ref[...] += jnp.dot(x_ref[...].astype(w_ref.dtype), w_ref[...],
                            preferred_element_type=jnp.float32)

    @pl.when(k == pl.num_programs(2) - 1)
    def _():
        o_ref[...] = (acc_ref[...] + b_ref[...]).astype(o_ref.dtype)


def matmul_bias_pallas(x, w, b, *, out_dtype=None, tm=512, tn=256, tk=512):
    M, K = x.shape
    N = w.shape[1]
    out_dtype = out_dtype or x.dtype
    tm = _pick_tile(M, tm, 8)        # large row tiles => W_in re-streamed fewer times
    tn = _pick_tile(N, tn, 128)
    tk = _pick_tile(K, tk, 128)
    grid = (M // tm, N // tn, K // tk)
    return pl.pallas_call(
        _matmul_bias_kernel,
        out_shape=jax.ShapeDtypeStruct((M, N), out_dtype),
        grid=grid,
        in_specs=[
            pl.BlockSpec((tm, tk), lambda i, j, k: (i, k)),
            pl.BlockSpec((tk, tn), lambda i, j, k: (k, j)),
            pl.BlockSpec((1, tn), lambda i, j, k: (0, j)),
        ],
        out_specs=pl.BlockSpec((tm, tn), lambda i, j, k: (i, j)),
        scratch_shapes=[pltpu.VMEM((tm, tn), jnp.float32)],
        compiler_params=_compiler_params(("parallel", "parallel", "arbitrary")),
    )(x, w, b.reshape(1, N))


# ---------------------------------------------------------------------------
# 2) Multi-head attention.
#    Grid = (batch, query-tiles): extra parallel axis keeps both v7x TCs busy at
#    small batch and bounds per-step score tensors to (tq, S).  Each head's
#    (tq, Dh) result is written straight into its column slice of the lane-dense
#    (1, tq, D) output block (no concat, minimal live VMEM).  Softmax
#    normalization is deferred to the (tq, Dh) result (S*Dh instead of S*S
#    multiplies).  The 1/sqrt(Dh) scale is pre-folded into W_in's Q columns.
# ---------------------------------------------------------------------------
def _mha_kernel(qkv_ref, o_ref, *, nhead, tq, seq_len):
    D = o_ref.shape[-1]
    Dh = D // nhead
    kv = qkv_ref[0]                                        # (S, 3D) in VMEM
    if tq == seq_len:
        q_rows = kv                                        # static: no slicing needed
    else:
        row0 = pl.multiple_of(pl.program_id(1) * tq, tq)
        q_rows = qkv_ref[0, pl.ds(row0, tq), :]            # (tq, 3D)

    for h in range(nhead):                                 # static unroll, direct stores
        q = q_rows[:, h * Dh:(h + 1) * Dh]                 # scale already folded in
        k = kv[:, D + h * Dh:D + (h + 1) * Dh]
        v = kv[:, 2 * D + h * Dh:2 * D + (h + 1) * Dh]
        # q @ k^T without an explicit transpose: contract last dims directly.
        s = jax.lax.dot_general(q, k, (((1,), (1,)), ((), ())),
                                preferred_element_type=jnp.float32)      # (tq, S)
        m = jnp.max(s, axis=-1, keepdims=True)
        p = jnp.exp(s - m)                                               # unnormalized
        l = jnp.sum(p, axis=-1, keepdims=True)                           # (tq, 1)
        o = jnp.dot(p.astype(v.dtype), v,
                    preferred_element_type=jnp.float32)                  # (tq, Dh)
        o_ref[0, :, h * Dh:(h + 1) * Dh] = (o * pl.reciprocal(l)).astype(o_ref.dtype)


def mha_pallas(qkv3, nhead, *, tq=256):
    B, S, D3 = qkv3.shape
    D = D3 // 3
    tq = _pick_tile(S, tq, 8)
    grid = (B, S // tq)
    return pl.pallas_call(
        functools.partial(_mha_kernel, nhead=nhead, tq=tq, seq_len=S),
        out_shape=jax.ShapeDtypeStruct((B, S, D), qkv3.dtype),
        grid=grid,
        in_specs=[pl.BlockSpec((1, S, D3), lambda b, qi: (b, 0, 0))],
        out_specs=pl.BlockSpec((1, tq, D), lambda b, qi: (b, qi, 0)),
        compiler_params=_compiler_params(("parallel", "parallel")),
    )(qkv3)


# ---------------------------------------------------------------------------
# 3) out-projection matmul + residual add + LayerNorm fused epilogue
# ---------------------------------------------------------------------------
def _matmul_add_ln_kernel(a_ref, w_ref, b_ref, res_ref, g_ref, bb_ref,
                          o_ref, acc_ref, *, eps):
    k = pl.program_id(1)

    @pl.when(k == 0)
    def _():
        acc_ref[...] = jnp.zeros_like(acc_ref)

    acc_ref[...] += jnp.dot(a_ref[...].astype(w_ref.dtype), w_ref[...],
                            preferred_element_type=jnp.float32)

    @pl.when(k == pl.num_programs(1) - 1)
    def _():
        y = acc_ref[...] + b_ref[...] + res_ref[...].astype(jnp.float32)
        mu = jnp.mean(y, axis=-1, keepdims=True)
        var = jnp.mean(jnp.square(y - mu), axis=-1, keepdims=True)
        yn = (y - mu) * jax.lax.rsqrt(var + eps)
        o_ref[...] = (yn * g_ref[...] + bb_ref[...]).astype(o_ref.dtype)


def matmul_add_ln_pallas(a, w, b, res, gamma, beta, *, eps=1e-5, tm=256, tk=512):
    M, K = a.shape
    N = w.shape[1]
    tm = _pick_tile(M, tm, 8)
    tk = _pick_tile(K, tk, 128)
    grid = (M // tm, K // tk)
    return pl.pallas_call(
        functools.partial(_matmul_add_ln_kernel, eps=eps),
        out_shape=jax.ShapeDtypeStruct((M, N), res.dtype),   # keep LN output in f32
        grid=grid,
        in_specs=[
            pl.BlockSpec((tm, tk), lambda i, k: (i, k)),   # attention output rows (bf16)
            pl.BlockSpec((tk, N), lambda i, k: (k, 0)),    # W_out (bf16)
            pl.BlockSpec((1, N), lambda i, k: (0, 0)),     # b_out (f32)
            pl.BlockSpec((tm, N), lambda i, k: (i, 0)),    # residual (pre-attn x, f32)
            pl.BlockSpec((1, N), lambda i, k: (0, 0)),     # gamma
            pl.BlockSpec((1, N), lambda i, k: (0, 0)),     # beta
        ],
        out_specs=pl.BlockSpec((tm, N), lambda i, k: (i, 0)),
        scratch_shapes=[pltpu.VMEM((tm, N), jnp.float32)],
        compiler_params=_compiler_params(("parallel", "arbitrary")),
    )(a, w, b.reshape(1, N), res, gamma.reshape(1, N), beta.reshape(1, N))


# ---------------------------------------------------------------------------
# 4) Fused FFN: relu(x@W1+b1) @ W2 + b2, + residual + LayerNorm.
#    Hidden dim (dim_feedforward) is tiled as a reduction axis; the (tm, tf)
#    hidden activation never leaves VMEM.  Matmul operands fed to the MXU in
#    the weights' (bf16) dtype; residual + LN stay f32.
# ---------------------------------------------------------------------------
def _ffn_add_ln_kernel(x_ref, w1_ref, b1_ref, w2_ref, b2_ref, g_ref, bb_ref,
                       o_ref, acc_ref, *, eps):
    j = pl.program_id(1)

    @pl.when(j == 0)
    def _():
        acc_ref[...] = jnp.zeros_like(acc_ref)

    h = jnp.dot(x_ref[...].astype(w1_ref.dtype), w1_ref[...],
                preferred_element_type=jnp.float32)
    h = jnp.maximum(h + b1_ref[...], 0.0)
    # Intentional: hidden activations are down-cast to the MXU compute dtype
    # (bf16 in mixed-precision mode) for the second matmul; accumulation is f32.
    acc_ref[...] += jnp.dot(h.astype(w2_ref.dtype), w2_ref[...],
                            preferred_element_type=jnp.float32)

    @pl.when(j == pl.num_programs(1) - 1)
    def _():
        y = acc_ref[...] + b2_ref[...] + x_ref[...].astype(jnp.float32)
        mu = jnp.mean(y, axis=-1, keepdims=True)
        var = jnp.mean(jnp.square(y - mu), axis=-1, keepdims=True)
        yn = (y - mu) * jax.lax.rsqrt(var + eps)
        o_ref[...] = (yn * g_ref[...] + bb_ref[...]).astype(o_ref.dtype)


def ffn_add_ln_pallas(x, w1, b1, w2, b2, gamma, beta, *, eps=1e-5, tm=256, tf=512):
    M, D = x.shape
    F = w1.shape[1]
    tm = _pick_tile(M, tm, 8)
    tf = _pick_tile(F, tf, 128)
    grid = (M // tm, F // tf)
    return pl.pallas_call(
        functools.partial(_ffn_add_ln_kernel, eps=eps),
        out_shape=jax.ShapeDtypeStruct((M, D), x.dtype),
        grid=grid,
        in_specs=[
            pl.BlockSpec((tm, D), lambda i, j: (i, 0)),    # x (matmul input + residual)
            pl.BlockSpec((D, tf), lambda i, j: (0, j)),    # W1 tile (bf16)
            pl.BlockSpec((1, tf), lambda i, j: (0, j)),    # b1 tile
            pl.BlockSpec((tf, D), lambda i, j: (j, 0)),    # W2 tile (bf16)
            pl.BlockSpec((1, D), lambda i, j: (0, 0)),     # b2
            pl.BlockSpec((1, D), lambda i, j: (0, 0)),     # gamma
            pl.BlockSpec((1, D), lambda i, j: (0, 0)),     # beta
        ],
        out_specs=pl.BlockSpec((tm, D), lambda i, j: (i, 0)),
        scratch_shapes=[pltpu.VMEM((tm, D), jnp.float32)],
        compiler_params=_compiler_params(("parallel", "arbitrary")),
    )(x, w1, b1.reshape(1, F), w2, b2.reshape(1, D),
      gamma.reshape(1, D), beta.reshape(1, D))


# ---------------------------------------------------------------------------
# GPTDecoderLayer forward
# ---------------------------------------------------------------------------
def init_params(key, d_model, nhead, dim_feedforward):
    ks = jax.random.split(key, 8)
    s = 0.02
    return {
        "in_proj_w": jax.random.normal(ks[0], (d_model, 3 * d_model), jnp.float32) * s,
        "in_proj_b": jax.random.normal(ks[1], (3 * d_model,), jnp.float32) * s,
        "out_proj_w": jax.random.normal(ks[2], (d_model, d_model), jnp.float32) * s,
        "out_proj_b": jax.random.normal(ks[3], (d_model,), jnp.float32) * s,
        "linear1_w": jax.random.normal(ks[4], (d_model, dim_feedforward), jnp.float32) * s,
        "linear1_b": jax.random.normal(ks[5], (dim_feedforward,), jnp.float32) * s,
        "linear2_w": jax.random.normal(ks[6], (dim_feedforward, d_model), jnp.float32) * s,
        "linear2_b": jax.random.normal(ks[7], (d_model,), jnp.float32) * s,
        "norm1_g": jnp.ones((d_model,), jnp.float32),
        "norm1_b": jnp.zeros((d_model,), jnp.float32),
        "norm2_g": jnp.ones((d_model,), jnp.float32),
        "norm2_b": jnp.zeros((d_model,), jnp.float32),
    }


def gpt_decoder_layer(tgt, params, *, nhead, compute_dtype=jnp.bfloat16):
    S, B, D = tgt.shape
    Dh = D // nhead
    scale = 1.0 / math.sqrt(Dh)

    # Fold 1/sqrt(Dh) into the Q columns of the in-projection (removes a per-token
    # VALU multiply inside the MHA kernel) and cast weights to the MXU compute
    # dtype once up front (halves weight HBM traffic in bf16 mode).
    w_in = (params["in_proj_w"].at[:, :D].multiply(scale)).astype(compute_dtype)
    b_in = params["in_proj_b"].at[:D].multiply(scale)
    w_out = params["out_proj_w"].astype(compute_dtype)
    w1 = params["linear1_w"].astype(compute_dtype)
    w2 = params["linear2_w"].astype(compute_dtype)

    # batch-major token rows (only layout change done in the wrapper)
    # TODO(synk): fold these two (S,B,D)<->(B,S,D) transposes into the first/last
    # kernels' index_maps to save two activation HBM round-trips.
    x = jnp.transpose(tgt, (1, 0, 2)).reshape(B * S, D)

    # ---- self-attention (dropout1 = identity) -----------------------------
    qkv = matmul_bias_pallas(x, w_in, b_in, out_dtype=compute_dtype)       # (B*S, 3D)
    attn = mha_pallas(qkv.reshape(B, S, 3 * D), nhead)                     # (B, S, D)
    x = matmul_add_ln_pallas(attn.reshape(B * S, D), w_out,
                             params["out_proj_b"], res=x,
                             gamma=params["norm1_g"], beta=params["norm1_b"])

    # ---- feed-forward (dropout, dropout2 = identity) -----------------------
    out = ffn_add_ln_pallas(x, w1, params["linear1_b"], w2, params["linear2_b"],
                            params["norm2_g"], params["norm2_b"])

    return jnp.transpose(out.reshape(B, S, D), (1, 0, 2))


# ---------------------------------------------------------------------------
# Pure-JAX reference (correctness check)
# ---------------------------------------------------------------------------
def reference_layer(tgt, params, nhead):
    S, B, D = tgt.shape
    H = nhead
    Dh = D // H
    scale = 1.0 / math.sqrt(Dh)

    def ln(y, g, b, eps=1e-5):
        mu = jnp.mean(y, axis=-1, keepdims=True)
        var = jnp.mean(jnp.square(y - mu), axis=-1, keepdims=True)
        return (y - mu) / jnp.sqrt(var + eps) * g + b

    x = tgt.reshape(S * B, D)
    qkv = x @ params["in_proj_w"] + params["in_proj_b"]
    q, k, v = qkv[:, :D], qkv[:, D:2 * D], qkv[:, 2 * D:]
    q = jnp.transpose(q.reshape(S, B * H, Dh), (1, 0, 2))
    k = jnp.transpose(k.reshape(S, B * H, Dh), (1, 0, 2))
    v = jnp.transpose(v.reshape(S, B * H, Dh), (1, 0, 2))
    s = jnp.einsum("bqd,bkd->bqk", q, k) * scale
    p = jax.nn.softmax(s, axis=-1)
    a = jnp.einsum("bqk,bkd->bqd", p, v)
    a = jnp.transpose(a, (1, 0, 2)).reshape(S * B, D)
    a = a @ params["out_proj_w"] + params["out_proj_b"]
    x = ln(x + a, params["norm1_g"], params["norm1_b"])
    h = jnp.maximum(x @ params["linear1_w"] + params["linear1_b"], 0.0)
    ff = h @ params["linear2_w"] + params["linear2_b"]
    x = ln(x + ff, params["norm2_g"], params["norm2_b"])
    return x.reshape(S, B, D)


# ---------------------------------------------------------------------------
if __name__ == "__main__":
    d_model, nhead, dim_feedforward = 32, 4, 64
    seq, batch = 8, 2

    key = jax.random.PRNGKey(0)
    k_inp, k_par = jax.random.split(key)
    tgt = jax.random.normal(k_inp, (seq, batch, d_model), jnp.float32)
    params = init_params(k_par, d_model, nhead, dim_feedforward)

    ref = reference_layer(tgt, params, nhead)

    # Strict numerics check: f32 compute path.
    fwd_f32 = jax.jit(functools.partial(gpt_decoder_layer, nhead=nhead,
                                        compute_dtype=jnp.float32))
    out_f32 = jax.block_until_ready(fwd_f32(tgt, params))
    assert out_f32.shape == (seq, batch, d_model)
    assert bool(jnp.all(jnp.isfinite(out_f32)))
    assert bool(jnp.allclose(out_f32, ref, atol=1e-3, rtol=1e-3)), "f32 mismatch vs reference"

    # Performance path: bf16 MXU operands, f32 accumulation / softmax / LN.
    fwd_bf16 = jax.jit(functools.partial(gpt_decoder_layer, nhead=nhead,
                                         compute_dtype=jnp.bfloat16))
    out_bf16 = jax.block_until_ready(fwd_bf16(tgt, params))
    assert out_bf16.shape == (seq, batch, d_model)
    assert bool(jnp.all(jnp.isfinite(out_bf16)))
    assert bool(jnp.allclose(out_bf16, ref, atol=3e-2, rtol=3e-2)), "bf16 mismatch vs reference"

    print("KERNEL_OK")
</pallas_src>

<mosaic_0001>
module attributes {stable_mosaic.version = 11 : i64} {
  func.func @_matmul_bias_kernel(%arg0: i32, %arg1: i32, %arg2: i32, %arg3: memref<16x32xf32, #tpu.memory_space<vmem>>, %arg4: memref<32x96xf32, #tpu.memory_space<vmem>>, %arg5: memref<1x96xf32, #tpu.memory_space<vmem>>, %arg6: memref<16x96xf32, #tpu.memory_space<vmem>>, %arg7: memref<16x96xf32, #tpu.memory_space<vmem>>) attributes {dimension_semantics = [#tpu.dimension_semantics<parallel>, #tpu.dimension_semantics<parallel>, #tpu.dimension_semantics<arbitrary>], iteration_bounds = array<i64: 1, 1, 1>, scalar_prefetch = 0 : i64, scratch_operands = 1 : i64, tpu.core_type = #tpu.core_type<tc>, window_params = [{transform_indices = @transform_0, window_bounds = array<i64: 16, 32>}, {transform_indices = @transform_1, window_bounds = array<i64: 32, 96>}, {transform_indices = @transform_2, window_bounds = array<i64: 1, 96>}, {transform_indices = @transform_3, window_bounds = array<i64: 16, 96>}]} {
    %c0_i32 = arith.constant 0 : i32
    %0 = arith.cmpi eq, %arg2, %c0_i32 : i32
    %1 = arith.extui %0 : i1 to i32
    %c0_i32_0 = arith.constant 0 : i32
    %2 = arith.cmpi ne, %1, %c0_i32_0 : i32
    scf.if %2 {
      %cst_10 = arith.constant 0.000000e+00 : f32
      %12 = vector.broadcast %cst_10 : f32 to vector<16x96xf32>
      %c0_11 = arith.constant 0 : index
      %c0_12 = arith.constant 0 : index
      %13 = vector.load %arg7[%c0_11, %c0_12] : memref<16x96xf32, #tpu.memory_space<vmem>>, vector<16x96xf32>
      tpu.vector_store %arg7[%c0_11, %c0_12], %12 {strides = array<i32>} : memref<16x96xf32, #tpu.memory_space<vmem>>, vector<16x96xf32>,
    } else {
    }
    %c0 = arith.constant 0 : index
    %c0_1 = arith.constant 0 : index
    %3 = vector.load %arg7[%c0, %c0_1] : memref<16x96xf32, #tpu.memory_space<vmem>>, vector<16x96xf32>
    %c0_2 = arith.constant 0 : index
    %c0_3 = arith.constant 0 : index
    %4 = vector.load %arg3[%c0_2, %c0_3] : memref<16x32xf32, #tpu.memory_space<vmem>>, vector<16x32xf32>
    %c0_4 = arith.constant 0 : index
    %c0_5 = arith.constant 0 : index
    %5 = vector.load %arg4[%c0_4, %c0_5] : memref<32x96xf32, #tpu.memory_space<vmem>>, vector<32x96xf32>
    %cst = arith.constant dense<0.000000e+00> : vector<16x96xf32>
    %6 = tpu.matmul %4, %5, %cst {dimension_numbers = #tpu.dot_dimension_numbers<[1], [0], [0], [1], [0, 0, 1, 1], [], []>} : vector<16x32xf32>, vector<32x96xf32>, vector<16x96xf32> -> vector<16x96xf32>
    %7 = arith.addf %3, %6 : vector<16x96xf32>
    %c0_6 = arith.constant 0 : index
    %c0_7 = arith.constant 0 : index
    %8 = vector.load %arg7[%c0_6, %c0_7] : memref<16x96xf32, #tpu.memory_space<vmem>>, vector<16x96xf32>
    tpu.vector_store %arg7[%c0_6, %c0_7], %7 {strides = array<i32>} : memref<16x96xf32, #tpu.memory_space<vmem>>, vector<16x96xf32>,
    %c0_i32_8 = arith.constant 0 : i32
    %9 = arith.cmpi eq, %arg2, %c0_i32_8 : i32
    %10 = arith.extui %9 : i1 to i32
    %c0_i32_9 = arith.constant 0 : i32
    %11 = arith.cmpi ne, %10, %c0_i32_9 : i32
    scf.if %11 {
      %c0_10 = arith.constant 0 : index
      %c0_11 = arith.constant 0 : index
      %12 = vector.load %arg7[%c0_10, %c0_11] : memref<16x96xf32, #tpu.memory_space<vmem>>, vector<16x96xf32>
      %c0_12 = arith.constant 0 : index
      %c0_13 = arith.constant 0 : index
      %13 = vector.load %arg5[%c0_12, %c0_13] : memref<1x96xf32, #tpu.memory_space<vmem>>, vector<1x96xf32>
      %14 = vector.broadcast %13 : vector<1x96xf32> to vector<16x96xf32>
      %15 = arith.addf %12, %14 : vector<16x96xf32>
      %c0_14 = arith.constant 0 : index
      %c0_15 = arith.constant 0 : index
      %16 = vector.load %arg6[%c0_14, %c0_15] : memref<16x96xf32, #tpu.memory_space<vmem>>, vector<16x96xf32>
      tpu.vector_store %arg6[%c0_14, %c0_15], %15 {strides = array<i32>} : memref<16x96xf32, #tpu.memory_space<vmem>>, vector<16x96xf32>,
    } else {
    }
    return
  }
  func.func @transform_0(%arg0: i32, %arg1: i32, %arg2: i32) -> (i32, i32) {
    %c0_i32 = arith.constant 0 : i32
    return %arg0, %arg2 : i32, i32
  }
  func.func @transform_1(%arg0: i32, %arg1: i32, %arg2: i32) -> (i32, i32) {
    %c0_i32 = arith.constant 0 : i32
    return %arg2, %arg1 : i32, i32
  }
  func.func @transform_2(%arg0: i32, %arg1: i32, %arg2: i32) -> (i32, i32) {
    %c0_i32 = arith.constant 0 : i32
    %c0_i32_0 = arith.constant 0 : i32
    return %c0_i32, %arg1 : i32, i32
  }
  func.func @transform_3(%arg0: i32, %arg1: i32, %arg2: i32) -> (i32, i32) {
    %c0_i32 = arith.constant 0 : i32
    return %arg0, %arg1 : i32, i32
  }
}

module attributes {stable_mosaic.version = 11 : i64} {
  func.func @_mha_kernel(%arg0: i32, %arg1: i32, %arg2: memref<1x8x96xf32, #tpu.memory_space<vmem>>, %arg3: memref<1x8x32xf32, #tpu.memory_space<vmem>>) attributes {dimension_semantics = [#tpu.dimension_semantics<parallel>, #tpu.dimension_semantics<parallel>], iteration_bounds = array<i64: 2, 1>, scalar_prefetch = 0 : i64, scratch_operands = 0 : i64, tpu.core_type = #tpu.core_type<tc>, window_params = [{transform_indices = @transform_0, window_bounds = array<i64: 1, 8, 96>}, {transform_indices = @transform_1, window_bounds = array<i64: 1, 8, 32>}]} {
    %c0 = arith.constant 0 : index
    %c0_0 = arith.constant 0 : index
    %c0_1 = arith.constant 0 : index
    %0 = vector.load %arg2[%c0, %c0_0, %c0_1] : memref<1x8x96xf32, #tpu.memory_space<vmem>>, vector<1x8x96xf32>
    %1 = vector.shape_cast %0 : vector<1x8x96xf32> to vector<8x96xf32>
    %2 = vector.extract_strided_slice %1 {offsets = [0, 0], sizes = [8, 8], strides = [1, 1]} : vector<8x96xf32> to vector<8x8xf32>
    %3 = vector.extract_strided_slice %1 {offsets = [0, 32], sizes = [8, 8], strides = [1, 1]} : vector<8x96xf32> to vector<8x8xf32>
    %4 = vector.extract_strided_slice %1 {offsets = [0, 64], sizes = [8, 8], strides = [1, 1]} : vector<8x96xf32> to vector<8x8xf32>
    %cst = arith.constant dense<0.000000e+00> : vector<8x8xf32>
    %5 = tpu.matmul %2, %3, %cst {dimension_numbers = #tpu.dot_dimension_numbers<[1], [1], [0], [0], [0, 0, 1, 0], [], []>} : vector<8x8xf32>, vector<8x8xf32>, vector<8x8xf32> -> vector<8x8xf32>
    %cst_2 = arith.constant dense<0xFF800000> : vector<8xf32>
    %6 = vector.multi_reduction <maximumf>, %5, %cst_2 [1] : vector<8x8xf32> to vector<8xf32>
    %7 = vector.shape_cast %6 : vector<8xf32> to vector<8x1xf32>
    %8 = vector.broadcast %7 : vector<8x1xf32> to vector<8x8xf32>
    %9 = arith.subf %5, %8 : vector<8x8xf32>
    %10 = math.exp %9 : vector<8x8xf32>
    %cst_3 = arith.constant dense<0.000000e+00> : vector<8xf32>
    %11 = vector.multi_reduction <add>, %10, %cst_3 [1] : vector<8x8xf32> to vector<8xf32>
    %12 = vector.shape_cast %11 : vector<8xf32> to vector<8x1xf32>
    %cst_4 = arith.constant dense<0.000000e+00> : vector<8x8xf32>
    %13 = tpu.matmul %10, %4, %cst_4 {dimension_numbers = #tpu.dot_dimension_numbers<[1], [0], [0], [1], [0, 0, 1, 1], [], []>} : vector<8x8xf32>, vector<8x8xf32>, vector<8x8xf32> -> vector<8x8xf32>
    %14 = tpu.reciprocal %12 : vector<8x1xf32> -> vector<8x1xf32>
    %15 = vector.broadcast %14 : vector<8x1xf32> to vector<8x8xf32>
    %16 = arith.mulf %13, %15 : vector<8x8xf32>
    %c0_5 = arith.constant 0 : index
    %c0_6 = arith.constant 0 : index
    %c0_7 = arith.constant 0 : index
    %17 = vector.load %arg3[%c0_5, %c0_6, %c0_7] : memref<1x8x32xf32, #tpu.memory_space<vmem>>, vector<1x8x8xf32>
    %18 = vector.shape_cast %17 : vector<1x8x8xf32> to vector<8x8xf32>
    %19 = vector.shape_cast %16 : vector<8x8xf32> to vector<1x8x8xf32>
    tpu.vector_store %arg3[%c0_5, %c0_6, %c0_7], %19 {strides = array<i32>} : memref<1x8x32xf32, #tpu.memory_space<vmem>>, vector<1x8x8xf32>,
    %20 = vector.extract_strided_slice %1 {offsets = [0, 8], sizes = [8, 8], strides = [1, 1]} : vector<8x96xf32> to vector<8x8xf32>
    %21 = vector.extract_strided_slice %1 {offsets = [0, 40], sizes = [8, 8], strides = [1, 1]} : vector<8x96xf32> to vector<8x8xf32>
    %22 = vector.extract_strided_slice %1 {offsets = [0, 72], sizes = [8, 8], strides = [1, 1]} : vector<8x96xf32> to vector<8x8xf32>
    %cst_8 = arith.constant dense<0.000000e+00> : vector<8x8xf32>
    %23 = tpu.matmul %20, %21, %cst_8 {dimension_numbers = #tpu.dot_dimension_numbers<[1], [1], [0], [0], [0, 0, 1, 0], [], []>} : vector<8x8xf32>, vector<8x8xf32>, vector<8x8xf32> -> vector<8x8xf32>
    %cst_9 = arith.constant dense<0xFF800000> : vector<8xf32>
    %24 = vector.multi_reduction <maximumf>, %23, %cst_9 [1] : vector<8x8xf32> to vector<8xf32>
    %25 = vector.shape_cast %24 : vector<8xf32> to vector<8x1xf32>
    %26 = vector.broadcast %25 : vector<8x1xf32> to vector<8x8xf32>
    %27 = arith.subf %23, %26 : vector<8x8xf32>
    %28 = math.exp %27 : vector<8x8xf32>
    %cst_10 = arith.constant dense<0.000000e+00> : vector<8xf32>
    %29 = vector.multi_reduction <add>, %28, %cst_10 [1] : vector<8x8xf32> to vector<8xf32>
    %30 = vector.shape_cast %29 : vector<8xf32> to vector<8x1xf32>
    %cst_11 = arith.constant dense<0.000000e+00> : vector<8x8xf32>
    %31 = tpu.matmul %28, %22, %cst_11 {dimension_numbers = #tpu.dot_dimension_numbers<[1], [0], [0], [1], [0, 0, 1, 1], [], []>} : vector<8x8xf32>, vector<8x8xf32>, vector<8x8xf32> -> vector<8x8xf32>
    %32 = tpu.reciprocal %30 : vector<8x1xf32> -> vector<8x1xf32>
    %33 = vector.broadcast %32 : vector<8x1xf32> to vector<8x8xf32>
    %34 = arith.mulf %31, %33 : vector<8x8xf32>
    %c0_12 = arith.constant 0 : index
    %c0_13 = arith.constant 0 : index
    %c8 = arith.constant 8 : index
    %35 = vector.load %arg3[%c0_12, %c0_13, %c8] : memref<1x8x32xf32, #tpu.memory_space<vmem>>, vector<1x8x8xf32>
    %36 = vector.shape_cast %35 : vector<1x8x8xf32> to vector<8x8xf32>
    %37 = vector.shape_cast %34 : vector<8x8xf32> to vector<1x8x8xf32>
    tpu.vector_store %arg3[%c0_12, %c0_13, %c8], %37 {strides = array<i32>} : memref<1x8x32xf32, #tpu.memory_space<vmem>>, vector<1x8x8xf32>,
    %38 = vector.extract_strided_slice %1 {offsets = [0, 16], sizes = [8, 8], strides = [1, 1]} : vector<8x96xf32> to vector<8x8xf32>
    %39 = vector.extract_strided_slice %1 {offsets = [0, 48], sizes = [8, 8], strides = [1, 1]} : vector<8x96xf32> to vector<8x8xf32>
    %40 = vector.extract_strided_slice %1 {offsets = [0, 80], sizes = [8, 8], strides = [1, 1]} : vector<8x96xf32> to vector<8x8xf32>
    %cst_14 = arith.constant dense<0.000000e+00> : vector<8x8xf32>
    %41 = tpu.matmul %38, %39, %cst_14 {dimension_numbers = #tpu.dot_dimension_numbers<[1], [1], [0], [0], [0, 0, 1, 0], [], []>} : vector<8x8xf32>, vector<8x8xf32>, vector<8x8xf32> -> vector<8x8xf32>
    %cst_15 = arith.constant dense<0xFF800000> : vector<8xf32>
    %42 = vector.multi_reduction <maximumf>, %41, %cst_15 [1] : vector<8x8xf32> to vector<8xf32>
    %43 = vector.shape_cast %42 : vector<8xf32> to vector<8x1xf32>
    %44 = vector.broadcast %43 : vector<8x1xf32> to vector<8x8xf32>
    %45 = arith.subf %41, %44 : vector<8x8xf32>
    %46 = math.exp %45 : vector<8x8xf32>
    %cst_16 = arith.constant dense<0.000000e+00> : vector<8xf32>
    %47 = vector.multi_reduction <add>, %46, %cst_16 [1] : vector<8x8xf32> to vector<8xf32>
    %48 = vector.shape_cast %47 : vector<8xf32> to vector<8x1xf32>
    %cst_17 = arith.constant dense<0.000000e+00> : vector<8x8xf32>
    %49 = tpu.matmul %46, %40, %cst_17 {dimension_numbers = #tpu.dot_dimension_numbers<[1], [0], [0], [1], [0, 0, 1, 1], [], []>} : vector<8x8xf32>, vector<8x8xf32>, vector<8x8xf32> -> vector<8x8xf32>
    %50 = tpu.reciprocal %48 : vector<8x1xf32> -> vector<8x1xf32>
    %51 = vector.broadcast %50 : vector<8x1xf32> to vector<8x8xf32>
    %52 = arith.mulf %49, %51 : vector<8x8xf32>
    %c0_18 = arith.constant 0 : index
    %c0_19 = arith.constant 0 : index
    %c16 = arith.constant 16 : index
    %53 = vector.load %arg3[%c0_18, %c0_19, %c16] : memref<1x8x32xf32, #tpu.memory_space<vmem>>, vector<1x8x8xf32>
    %54 = vector.shape_cast %53 : vector<1x8x8xf32> to vector<8x8xf32>
    %55 = vector.shape_cast %52 : vector<8x8xf32> to vector<1x8x8xf32>
    tpu.vector_store %arg3[%c0_18, %c0_19, %c16], %55 {strides = array<i32>} : memref<1x8x32xf32, #tpu.memory_space<vmem>>, vector<1x8x8xf32>,
    %56 = vector.extract_strided_slice %1 {offsets = [0, 24], sizes = [8, 8], strides = [1, 1]} : vector<8x96xf32> to vector<8x8xf32>
    %57 = vector.extract_strided_slice %1 {offsets = [0, 56], sizes = [8, 8], strides = [1, 1]} : vector<8x96xf32> to vector<8x8xf32>
    %58 = vector.extract_strided_slice %1 {offsets = [0, 88], sizes = [8, 8], strides = [1, 1]} : vector<8x96xf32> to vector<8x8xf32>
    %cst_20 = arith.constant dense<0.000000e+00> : vector<8x8xf32>
    %59 = tpu.matmul %56, %57, %cst_20 {dimension_numbers = #tpu.dot_dimension_numbers<[1], [1], [0], [0], [0, 0, 1, 0], [], []>} : vector<8x8xf32>, vector<8x8xf32>, vector<8x8xf32> -> vector<8x8xf32>
    %cst_21 = arith.constant dense<0xFF800000> : vector<8xf32>
    %60 = vector.multi_reduction <maximumf>, %59, %cst_21 [1] : vector<8x8xf32> to vector<8xf32>
    %61 = vector.shape_cast %60 : vector<8xf32> to vector<8x1xf32>
    %62 = vector.broadcast %61 : vector<8x1xf32> to vector<8x8xf32>
    %63 = arith.subf %59, %62 : vector<8x8xf32>
    %64 = math.exp %63 : vector<8x8xf32>
    %cst_22 = arith.constant dense<0.000000e+00> : vector<8xf32>
    %65 = vector.multi_reduction <add>, %64, %cst_22 [1] : vector<8x8xf32> to vector<8xf32>
    %66 = vector.shape_cast %65 : vector<8xf32> to vector<8x1xf32>
    %cst_23 = arith.constant dense<0.000000e+00> : vector<8x8xf32>
    %67 = tpu.matmul %64, %58, %cst_23 {dimension_numbers = #tpu.dot_dimension_numbers<[1], [0], [0], [1], [0, 0, 1, 1], [], []>} : vector<8x8xf32>, vector<8x8xf32>, vector<8x8xf32> -> vector<8x8xf32>
    %68 = tpu.reciprocal %66 : vector<8x1xf32> -> vector<8x1xf32>
    %69 = vector.broadcast %68 : vector<8x1xf32> to vector<8x8xf32>
    %70 = arith.mulf %67, %69 : vector<8x8xf32>
    %c0_24 = arith.constant 0 : index
    %c0_25 = arith.constant 0 : index
    %c24 = arith.constant 24 : index
    %71 = vector.load %arg3[%c0_24, %c0_25, %c24] : memref<1x8x32xf32, #tpu.memory_space<vmem>>, vector<1x8x8xf32>
    %72 = vector.shape_cast %71 : vector<1x8x8xf32> to vector<8x8xf32>
    %73 = vector.shape_cast %70 : vector<8x8xf32> to vector<1x8x8xf32>
    tpu.vector_store %arg3[%c0_24, %c0_25, %c24], %73 {strides = array<i32>} : memref<1x8x32xf32, #tpu.memory_space<vmem>>, vector<1x8x8xf32>,
    return
  }
  func.func @transform_0(%arg0: i32, %arg1: i32) -> (i32, i32, i32) {
    %c0_i32 = arith.constant 0 : i32
    %c0_i32_0 = arith.constant 0 : i32
    %c0_i32_1 = arith.constant 0 : i32
    return %arg0, %c0_i32, %c0_i32_0 : i32, i32, i32
  }
  func.func @transform_1(%arg0: i32, %arg1: i32) -> (i32, i32, i32) {
    %c0_i32 = arith.constant 0 : i32
    %c0_i32_0 = arith.constant 0 : i32
    return %arg0, %arg1, %c0_i32 : i32, i32, i32
  }
}

module attributes {stable_mosaic.version = 11 : i64} {
  func.func @_matmul_add_ln_kernel(%arg0: i32, %arg1: i32, %arg2: memref<16x32xf32, #tpu.memory_space<vmem>>, %arg3: memref<32x32xf32, #tpu.memory_space<vmem>>, %arg4: memref<1x32xf32, #tpu.memory_space<vmem>>, %arg5: memref<16x32xf32, #tpu.memory_space<vmem>>, %arg6: memref<1x32xf32, #tpu.memory_space<vmem>>, %arg7: memref<1x32xf32, #tpu.memory_space<vmem>>, %arg8: memref<16x32xf32, #tpu.memory_space<vmem>>, %arg9: memref<16x32xf32, #tpu.memory_space<vmem>>) attributes {dimension_semantics = [#tpu.dimension_semantics<parallel>, #tpu.dimension_semantics<arbitrary>], iteration_bounds = array<i64: 1, 1>, scalar_prefetch = 0 : i64, scratch_operands = 1 : i64, tpu.core_type = #tpu.core_type<tc>, window_params = [{transform_indices = @transform_0, window_bounds = array<i64: 16, 32>}, {transform_indices = @transform_1, window_bounds = array<i64: 32, 32>}, {pipeline_mode = #tpu.pipeline_mode<synchronous>, transform_indices = @transform_2, window_bounds = array<i64: 1, 32>}, {transform_indices = @transform_3, window_bounds = array<i64: 16, 32>}, {pipeline_mode = #tpu.pipeline_mode<synchronous>, transform_indices = @transform_4, window_bounds = array<i64: 1, 32>}, {pipeline_mode = #tpu.pipeline_mode<synchronous>, transform_indices = @transform_5, window_bounds = array<i64: 1, 32>}, {transform_indices = @transform_6, window_bounds = array<i64: 16, 32>}]} {
    %c0_i32 = arith.constant 0 : i32
    %0 = arith.cmpi eq, %arg1, %c0_i32 : i32
    %1 = arith.extui %0 : i1 to i32
    %c0_i32_0 = arith.constant 0 : i32
    %2 = arith.cmpi ne, %1, %c0_i32_0 : i32
    scf.if %2 {
      %cst_10 = arith.constant 0.000000e+00 : f32
      %12 = vector.broadcast %cst_10 : f32 to vector<16x32xf32>
      %c0_11 = arith.constant 0 : index
      %c0_12 = arith.constant 0 : index
      %13 = vector.load %arg9[%c0_11, %c0_12] : memref<16x32xf32, #tpu.memory_space<vmem>>, vector<16x32xf32>
      tpu.vector_store %arg9[%c0_11, %c0_12], %12 {strides = array<i32>} : memref<16x32xf32, #tpu.memory_space<vmem>>, vector<16x32xf32>,
    } else {
    }
    %c0 = arith.constant 0 : index
    %c0_1 = arith.constant 0 : index
    %3 = vector.load %arg9[%c0, %c0_1] : memref<16x32xf32, #tpu.memory_space<vmem>>, vector<16x32xf32>
    %c0_2 = arith.constant 0 : index
    %c0_3 = arith.constant 0 : index
    %4 = vector.load %arg2[%c0_2, %c0_3] : memref<16x32xf32, #tpu.memory_space<vmem>>, vector<16x32xf32>
    %c0_4 = arith.constant 0 : index
    %c0_5 = arith.constant 0 : index
    %5 = vector.load %arg3[%c0_4, %c0_5] : memref<32x32xf32, #tpu.memory_space<vmem>>, vector<32x32xf32>
    %cst = arith.constant dense<0.000000e+00> : vector<16x32xf32>
    %6 = tpu.matmul %4, %5, %cst {dimension_numbers = #tpu.dot_dimension_numbers<[1], [0], [0], [1], [0, 0, 1, 1], [], []>} : vector<16x32xf32>, vector<32x32xf32>, vector<16x32xf32> -> vector<16x32xf32>
    %7 = arith.addf %3, %6 : vector<16x32xf32>
    %c0_6 = arith.constant 0 : index
    %c0_7 = arith.constant 0 : index
    %8 = vector.load %arg9[%c0_6, %c0_7] : memref<16x32xf32, #tpu.memory_space<vmem>>, vector<16x32xf32>
    tpu.vector_store %arg9[%c0_6, %c0_7], %7 {strides = array<i32>} : memref<16x32xf32, #tpu.memory_space<vmem>>, vector<16x32xf32>,
    %c0_i32_8 = arith.constant 0 : i32
    %9 = arith.cmpi eq, %arg1, %c0_i32_8 : i32
    %10 = arith.extui %9 : i1 to i32
    %c0_i32_9 = arith.constant 0 : i32
    %11 = arith.cmpi ne, %10, %c0_i32_9 : i32
    scf.if %11 {
      %c0_10 = arith.constant 0 : index
      %c0_11 = arith.constant 0 : index
      %12 = vector.load %arg9[%c0_10, %c0_11] : memref<16x32xf32, #tpu.memory_space<vmem>>, vector<16x32xf32>
      %c0_12 = arith.constant 0 : index
      %c0_13 = arith.constant 0 : index
      %13 = vector.load %arg4[%c0_12, %c0_13] : memref<1x32xf32, #tpu.memory_space<vmem>>, vector<1x32xf32>
      %14 = vector.broadcast %13 : vector<1x32xf32> to vector<16x32xf32>
      %15 = arith.addf %12, %14 : vector<16x32xf32>
      %c0_14 = arith.constant 0 : index
      %c0_15 = arith.constant 0 : index
      %16 = vector.load %arg5[%c0_14, %c0_15] : memref<16x32xf32, #tpu.memory_space<vmem>>, vector<16x32xf32>
      %17 = arith.addf %15, %16 : vector<16x32xf32>
      %cst_16 = arith.constant dense<0.000000e+00> : vector<16xf32>
      %18 = vector.multi_reduction <add>, %17, %cst_16 [1] : vector<16x32xf32> to vector<16xf32>
      %19 = vector.shape_cast %18 : vector<16xf32> to vector<16x1xf32>
      %cst_17 = arith.constant 3.200000e+01 : f32
      %20 = vector.broadcast %cst_17 : f32 to vector<16x1xf32>
      %21 = arith.divf %19, %20 : vector<16x1xf32>
      %22 = vector.broadcast %21 : vector<16x1xf32> to vector<16x32xf32>
      %23 = arith.subf %17, %22 : vector<16x32xf32>
      %24 = arith.mulf %23, %23 : vector<16x32xf32>
      %cst_18 = arith.constant dense<0.000000e+00> : vector<16xf32>
      %25 = vector.multi_reduction <add>, %24, %cst_18 [1] : vector<16x32xf32> to vector<16xf32>
      %26 = vector.shape_cast %25 : vector<16xf32> to vector<16x1xf32>
      %cst_19 = arith.constant 3.200000e+01 : f32
      %27 = vector.broadcast %cst_19 : f32 to vector<16x1xf32>
      %28 = arith.divf %26, %27 : vector<16x1xf32>
      %29 = vector.broadcast %21 : vector<16x1xf32> to vector<16x32xf32>
      %30 = arith.subf %17, %29 : vector<16x32xf32>
      %cst_20 = arith.constant 9.99999974E-6 : f32
      %31 = vector.broadcast %cst_20 : f32 to vector<16x1xf32>
      %32 = arith.addf %28, %31 : vector<16x1xf32>
      %33 = math.rsqrt %32 : vector<16x1xf32>
      %34 = vector.broadcast %33 : vector<16x1xf32> to vector<16x32xf32>
      %35 = arith.mulf %30, %34 : vector<16x32xf32>
      %c0_21 = arith.constant 0 : index
      %c0_22 = arith.constant 0 : index
      %36 = vector.load %arg6[%c0_21, %c0_22] : memref<1x32xf32, #tpu.memory_space<vmem>>, vector<1x32xf32>
      %37 = vector.broadcast %36 : vector<1x32xf32> to vector<16x32xf32>
      %38 = arith.mulf %35, %37 : vector<16x32xf32>
      %c0_23 = arith.constant 0 : index
      %c0_24 = arith.constant 0 : index
      %39 = vector.load %arg7[%c0_23, %c0_24] : memref<1x32xf32, #tpu.memory_space<vmem>>, vector<1x32xf32>
      %40 = vector.broadcast %39 : vector<1x32xf32> to vector<16x32xf32>
      %41 = arith.addf %38, %40 : vector<16x32xf32>
      %c0_25 = arith.constant 0 : index
      %c0_26 = arith.constant 0 : index
      %42 = vector.load %arg8[%c0_25, %c0_26] : memref<16x32xf32, #tpu.memory_space<vmem>>, vector<16x32xf32>
      tpu.vector_store %arg8[%c0_25, %c0_26], %41 {strides = array<i32>} : memref<16x32xf32, #tpu.memory_space<vmem>>, vector<16x32xf32>,
    } else {
    }
    return
  }
  func.func @transform_0(%arg0: i32, %arg1: i32) -> (i32, i32) {
    %c0_i32 = arith.constant 0 : i32
    return %arg0, %arg1 : i32, i32
  }
  func.func @transform_1(%arg0: i32, %arg1: i32) -> (i32, i32) {
    %c0_i32 = arith.constant 0 : i32
    %c0_i32_0 = arith.constant 0 : i32
    return %arg1, %c0_i32 : i32, i32
  }
  func.func @transform_2(%arg0: i32, %arg1: i32) -> (i32, i32) {
    %c0_i32 = arith.constant 0 : i32
    %c0_i32_0 = arith.constant 0 : i32
    %c0_i32_1 = arith.constant 0 : i32
    return %c0_i32, %c0_i32_0 : i32, i32
  }
  func.func @transform_3(%arg0: i32, %arg1: i32) -> (i32, i32) {
    %c0_i32 = arith.constant 0 : i32
    %c0_i32_0 = arith.constant 0 : i32
    return %arg0, %c0_i32 : i32, i32
  }
  func.func @transform_4(%arg0: i32, %arg1: i32) -> (i32, i32) {
    %c0_i32 = arith.constant 0 : i32
    %c0_i32_0 = arith.constant 0 : i32
    %c0_i32_1 = arith.constant 0 : i32
    return %c0_i32, %c0_i32_0 : i32, i32
  }
  func.func @transform_5(%arg0: i32, %arg1: i32) -> (i32, i32) {
    %c0_i32 = arith.constant 0 : i32
    %c0_i32_0 = arith.constant 0 : i32
    %c0_i32_1 = arith.constant 0 : i32
    return %c0_i32, %c0_i32_0 : i32, i32
  }
  func.func @transform_6(%arg0: i32, %arg1: i32) -> (i32, i32) {
    %c0_i32 = arith.constant 0 : i32
    %c0_i32_0 = arith.constant 0 : i32
    return %arg0, %c0_i32 : i32, i32
  }
}

module attributes {stable_mosaic.version = 11 : i64} {
  func.func @_ffn_add_ln_kernel(%arg0: i32, %arg1: i32, %arg2: memref<16x32xf32, #tpu.memory_space<vmem>>, %arg3: memref<32x64xf32, #tpu.memory_space<vmem>>, %arg4: memref<1x64xf32, #tpu.memory_space<vmem>>, %arg5: memref<64x32xf32, #tpu.memory_space<vmem>>, %arg6: memref<1x32xf32, #tpu.memory_space<vmem>>, %arg7: memref<1x32xf32, #tpu.memory_space<vmem>>, %arg8: memref<1x32xf32, #tpu.memory_space<vmem>>, %arg9: memref<16x32xf32, #tpu.memory_space<vmem>>, %arg10: memref<16x32xf32, #tpu.memory_space<vmem>>) attributes {dimension_semantics = [#tpu.dimension_semantics<parallel>, #tpu.dimension_semantics<arbitrary>], iteration_bounds = array<i64: 1, 1>, scalar_prefetch = 0 : i64, scratch_operands = 1 : i64, tpu.core_type = #tpu.core_type<tc>, window_params = [{transform_indices = @transform_0, window_bounds = array<i64: 16, 32>}, {transform_indices = @transform_1, window_bounds = array<i64: 32, 64>}, {transform_indices = @transform_2, window_bounds = array<i64: 1, 64>}, {transform_indices = @transform_3, window_bounds = array<i64: 64, 32>}, {pipeline_mode = #tpu.pipeline_mode<synchronous>, transform_indices = @transform_4, window_bounds = array<i64: 1, 32>}, {pipeline_mode = #tpu.pipeline_mode<synchronous>, transform_indices = @transform_5, window_bounds = array<i64: 1, 32>}, {pipeline_mode = #tpu.pipeline_mode<synchronous>, transform_indices = @transform_6, window_bounds = array<i64: 1, 32>}, {transform_indices = @transform_7, window_bounds = array<i64: 16, 32>}]} {
    %c0_i32 = arith.constant 0 : i32
    %0 = arith.cmpi eq, %arg1, %c0_i32 : i32
    %1 = arith.extui %0 : i1 to i32
    %c0_i32_0 = arith.constant 0 : i32
    %2 = arith.cmpi ne, %1, %c0_i32_0 : i32
    scf.if %2 {
      %cst_16 = arith.constant 0.000000e+00 : f32
      %19 = vector.broadcast %cst_16 : f32 to vector<16x32xf32>
      %c0_17 = arith.constant 0 : index
      %c0_18 = arith.constant 0 : index
      %20 = vector.load %arg10[%c0_17, %c0_18] : memref<16x32xf32, #tpu.memory_space<vmem>>, vector<16x32xf32>
      tpu.vector_store %arg10[%c0_17, %c0_18], %19 {strides = array<i32>} : memref<16x32xf32, #tpu.memory_space<vmem>>, vector<16x32xf32>,
    } else {
    }
    %c0 = arith.constant 0 : index
    %c0_1 = arith.constant 0 : index
    %3 = vector.load %arg2[%c0, %c0_1] : memref<16x32xf32, #tpu.memory_space<vmem>>, vector<16x32xf32>
    %c0_2 = arith.constant 0 : index
    %c0_3 = arith.constant 0 : index
    %4 = vector.load %arg3[%c0_2, %c0_3] : memref<32x64xf32, #tpu.memory_space<vmem>>, vector<32x64xf32>
    %cst = arith.constant dense<0.000000e+00> : vector<16x64xf32>
    %5 = tpu.matmul %3, %4, %cst {dimension_numbers = #tpu.dot_dimension_numbers<[1], [0], [0], [1], [0, 0, 1, 1], [], []>} : vector<16x32xf32>, vector<32x64xf32>, vector<16x64xf32> -> vector<16x64xf32>
    %c0_4 = arith.constant 0 : index
    %c0_5 = arith.constant 0 : index
    %6 = vector.load %arg4[%c0_4, %c0_5] : memref<1x64xf32, #tpu.memory_space<vmem>>, vector<1x64xf32>
    %7 = vector.broadcast %6 : vector<1x64xf32> to vector<16x64xf32>
    %8 = arith.addf %5, %7 : vector<16x64xf32>
    %cst_6 = arith.constant 0.000000e+00 : f32
    %9 = vector.broadcast %cst_6 : f32 to vector<16x64xf32>
    %10 = arith.maximumf %8, %9 : vector<16x64xf32>
    %c0_7 = arith.constant 0 : index
    %c0_8 = arith.constant 0 : index
    %11 = vector.load %arg10[%c0_7, %c0_8] : memref<16x32xf32, #tpu.memory_space<vmem>>, vector<16x32xf32>
    %c0_9 = arith.constant 0 : index
    %c0_10 = arith.constant 0 : index
    %12 = vector.load %arg5[%c0_9, %c0_10] : memref<64x32xf32, #tpu.memory_space<vmem>>, vector<64x32xf32>
    %cst_11 = arith.constant dense<0.000000e+00> : vector<16x32xf32>
    %13 = tpu.matmul %10, %12, %cst_11 {dimension_numbers = #tpu.dot_dimension_numbers<[1], [0], [0], [1], [0, 0, 1, 1], [], []>} : vector<16x64xf32>, vector<64x32xf32>, vector<16x32xf32> -> vector<16x32xf32>
    %14 = arith.addf %11, %13 : vector<16x32xf32>
    %c0_12 = arith.constant 0 : index
    %c0_13 = arith.constant 0 : index
    %15 = vector.load %arg10[%c0_12, %c0_13] : memref<16x32xf32, #tpu.memory_space<vmem>>, vector<16x32xf32>
    tpu.vector_store %arg10[%c0_12, %c0_13], %14 {strides = array<i32>} : memref<16x32xf32, #tpu.memory_space<vmem>>, vector<16x32xf32>,
    %c0_i32_14 = arith.constant 0 : i32
    %16 = arith.cmpi eq, %arg1, %c0_i32_14 : i32
    %17 = arith.extui %16 : i1 to i32
    %c0_i32_15 = arith.constant 0 : i32
    %18 = arith.cmpi ne, %17, %c0_i32_15 : i32
    scf.if %18 {
      %c0_16 = arith.constant 0 : index
      %c0_17 = arith.constant 0 : index
      %19 = vector.load %arg10[%c0_16, %c0_17] : memref<16x32xf32, #tpu.memory_space<vmem>>, vector<16x32xf32>
      %c0_18 = arith.constant 0 : index
      %c0_19 = arith.constant 0 : index
      %20 = vector.load %arg6[%c0_18, %c0_19] : memref<1x32xf32, #tpu.memory_space<vmem>>, vector<1x32xf32>
      %21 = vector.broadcast %20 : vector<1x32xf32> to vector<16x32xf32>
      %22 = arith.addf %19, %21 : vector<16x32xf32>
      %c0_20 = arith.constant 0 : index
      %c0_21 = arith.constant 0 : index
      %23 = vector.load %arg2[%c0_20, %c0_21] : memref<16x32xf32, #tpu.memory_space<vmem>>, vector<16x32xf32>
      %24 = arith.addf %22, %23 : vector<16x32xf32>
      %cst_22 = arith.constant dense<0.000000e+00> : vector<16xf32>
      %25 = vector.multi_reduction <add>, %24, %cst_22 [1] : vector<16x32xf32> to vector<16xf32>
      %26 = vector.shape_cast %25 : vector<16xf32> to vector<16x1xf32>
      %cst_23 = arith.constant 3.200000e+01 : f32
      %27 = vector.broadcast %cst_23 : f32 to vector<16x1xf32>
      %28 = arith.divf %26, %27 : vector<16x1xf32>
      %29 = vector.broadcast %28 : vector<16x1xf32> to vector<16x32xf32>
      %30 = arith.subf %24, %29 : vector<16x32xf32>
      %31 = arith.mulf %30, %30 : vector<16x32xf32>
      %cst_24 = arith.constant dense<0.000000e+00> : vector<16xf32>
      %32 = vector.multi_reduction <add>, %31, %cst_24 [1] : vector<16x32xf32> to vector<16xf32>
      %33 = vector.shape_cast %32 : vector<16xf32> to vector<16x1xf32>
      %cst_25 = arith.constant 3.200000e+01 : f32
      %34 = vector.broadcast %cst_25 : f32 to vector<16x1xf32>
      %35 = arith.divf %33, %34 : vector<16x1xf32>
      %36 = vector.broadcast %28 : vector<16x1xf32> to vector<16x32xf32>
      %37 = arith.subf %24, %36 : vector<16x32xf32>
      %cst_26 = arith.constant 9.99999974E-6 : f32
      %38 = vector.broadcast %cst_26 : f32 to vector<16x1xf32>
      %39 = arith.addf %35, %38 : vector<16x1xf32>
      %40 = math.rsqrt %39 : vector<16x1xf32>
      %41 = vector.broadcast %40 : vector<16x1xf32> to vector<16x32xf32>
      %42 = arith.mulf %37, %41 : vector<16x32xf32>
      %c0_27 = arith.constant 0 : index
      %c0_28 = arith.constant 0 : index
      %43 = vector.load %arg7[%c0_27, %c0_28] : memref<1x32xf32, #tpu.memory_space<vmem>>, vector<1x32xf32>
      %44 = vector.broadcast %43 : vector<1x32xf32> to vector<16x32xf32>
      %45 = arith.mulf %42, %44 : vector<16x32xf32>
      %c0_29 = arith.constant 0 : index
      %c0_30 = arith.constant 0 : index
      %46 = vector.load %arg8[%c0_29, %c0_30] : memref<1x32xf32, #tpu.memory_space<vmem>>, vector<1x32xf32>
      %47 = vector.broadcast %46 : vector<1x32xf32> to vector<16x32xf32>
      %48 = arith.addf %45, %47 : vector<16x32xf32>
      %c0_31 = arith.constant 0 : index
      %c0_32 = arith.constant 0 : index
      %49 = vector.load %arg9[%c0_31, %c0_32] : memref<16x32xf32, #tpu.memory_space<vmem>>, vector<16x32xf32>
      tpu.vector_store %arg9[%c0_31, %c0_32], %48 {strides = array<i32>} : memref<16x32xf32, #tpu.memory_space<vmem>>, vector<16x32xf32>,
    } else {
    }
    return
  }
  func.func @transform_0(%arg0: i32, %arg1: i32) -> (i32, i32) {
    %c0_i32 = arith.constant 0 : i32
    %c0_i32_0 = arith.constant 0 : i32
    return %arg0, %c0_i32 : i32, i32
  }
  func.func @transform_1(%arg0: i32, %arg1: i32) -> (i32, i32) {
    %c0_i32 = arith.constant 0 : i32
    %c0_i32_0 = arith.constant 0 : i32
    return %c0_i32, %arg1 : i32, i32
  }
  func.func @transform_2(%arg0: i32, %arg1: i32) -> (i32, i32) {
    %c0_i32 = arith.constant 0 : i32
    %c0_i32_0 = arith.constant 0 : i32
    return %c0_i32, %arg1 : i32, i32
  }
  func.func @transform_3(%arg0: i32, %arg1: i32) -> (i32, i32) {
    %c0_i32 = arith.constant 0 : i32
    %c0_i32_0 = arith.constant 0 : i32
    return %arg1, %c0_i32 : i32, i32
  }
  func.func @transform_4(%arg0: i32, %arg1: i32) -> (i32, i32) {
    %c0_i32 = arith.constant 0 : i32
    %c0_i32_0 = arith.constant 0 : i32
    %c0_i32_1 = arith.constant 0 : i32
    return %c0_i32, %c0_i32_0 : i32, i32
  }
  func.func @transform_5(%arg0: i32, %arg1: i32) -> (i32, i32) {
    %c0_i32 = arith.constant 0 : i32
    %c0_i32_0 = arith.constant 0 : i32
    %c0_i32_1 = arith.constant 0 : i32
    return %c0_i32, %c0_i32_0 : i32, i32
  }
  func.func @transform_6(%arg0: i32, %arg1: i32) -> (i32, i32) {
    %c0_i32 = arith.constant 0 : i32
    %c0_i32_0 = arith.constant 0 : i32
    %c0_i32_1 = arith.constant 0 : i32
    return %c0_i32, %c0_i32_0 : i32, i32
  }
  func.func @transform_7(%arg0: i32, %arg1: i32) -> (i32, i32) {
    %c0_i32 = arith.constant 0 : i32
    %c0_i32_0 = arith.constant 0 : i32
    return %arg0, %c0_i32 : i32, i32
  }
}

</mosaic_0001>

<bundles_post_ra>
// kernel: gpt_decoder_layer.4
= control target key start
LH: loop header
LB: loop body
LE: loop exit
PB: predicated region body
PF: predicated region fallthrough
CT: control target
= control target key end

     0   :  { %vm29_vm0 = vcmask 261120   ;;  %vm18_vm1 = vcmask 785408   ;;  %v165_v3 = vmov 0.0   ;;  %s221_s1 = inlined_call_operand.vmem [shape: f32[32,96], index: 1, kind: input, shape index: {}]   ;;  %s222_s0 = inlined_call_operand.vmem [shape: f32[16,32], index: 0, kind: input, shape index: {}]   ;;  %s223_s2 = inlined_call_operand.vmem [shape: f32[1,96], index: 2, kind: input, shape index: {}]   ;;  %s224_s3 = inlined_call_operand.vmem [shape: f32[16,96], index: 3, kind: output, shape index: {}]  }
   0x1   :  { %v25_v0 = vld [vmem:[%s221_s1] sm:$0xff]  ;;  %v26_v1 = vld [vmem:[%s221_s1 + $0x8] sm:$0xff]  ;;  %v27_v2 = vld [vmem:[%s221_s1 + $0x10] sm:$0xff]  ;;  %20 = vst.msk [vmem:[#allocation2 + $0x8] sm:$0xff] %vm18_vm1, %v165_v3 }
   0x2   :  { %19 = vst.msk [vmem:[#allocation2] sm:$0xff] %vm18_vm1, %v165_v3  ;;  %v156_v4 = vpack.c.bf16 %v26_v1, %v25_v0  ;;  %v28_v5 = vld [vmem:[%s221_s1 + $0x18] sm:$0xff]  ;;  %v23_v6 = vld [vmem:[%s222_s0] sm:$0xff]  ;;  %v24_v8 = vld [vmem:[%s222_s0 + $0x8] sm:$0xff] }
   0x3   :  { %v160_v7 = vpack.c.bf16 %v28_v5, %v27_v2  ;;  %153 = vmatprep.mubr.msk.f32.mxu0 %vm29_vm0, %v23_v6  ;;  %v138_v15 = vld [vmem:[%s223_s2] ss:$0 sm:$0xff] }
   0x4   :  { %157 = vmatprep.subr.bf16.mxu0 %v156_v4 }
   0x5   :  { %159 = vmatpush3.bf16.msra.mxu0 %v156_v4 }
   0x6   :  { %161 = vmatprep.subr.bf16.mxu0 %v160_v7 }
   0x8   :  { %v22_v9 = vld [vmem:[#allocation2 + $0x8] sm:$0xff] }
   0x9   :  { %163 = vmatpush3.bf16.msra.mxu0 %v160_v7  ;;  %v21_v10 = vld [vmem:[#allocation2] sm:$0xff] }
   0xc   :  { %154 = vmatmul.mubr.msk.f32.vlgmr.msra.gmra.mrb[0].mxu0 %vm29_vm0, %v24_v8 }
  0xdf   :  { %v155_v11 = vpop.f32.mrb[0].mxu0 }
  0xe0   :  { %v112_v12 = vadd.f32 %v155_v11, %v22_v9  ;;  %v102_v13 = vpop.f32.mrb[1].mxu0 }
  0xe1   :  { %v111_v14 = vadd.f32 %v102_v13, %v21_v10 }
  0xe2   :  { %115 = vst.msk [vmem:[#allocation2 + $0x8] sm:$0xff] %vm18_vm1, %v112_v12 }
  0xe3   :  { %114 = vst.msk [vmem:[#allocation2] sm:$0xff] %vm18_vm1, %v111_v14 }
  0xe9   :  { %v120_v16 = vld [vmem:[#allocation2 + $0x8] sm:$0xff] }
  0xea   :  { %v129_v17 = vadd.f32 %v138_v15, %v120_v16  ;;  %v119_v18 = vld [vmem:[#allocation2] sm:$0xff] }
  0xeb   :  { %v128_v19 = vadd.f32 %v138_v15, %v119_v18 }
  0xec   :  { %131 = vst.msk [vmem:[%s224_s3 + $0x8] sm:$0xff] %vm18_vm1, %v129_v17 }
  0xed   :  { %130 = vst.msk [vmem:[%s224_s3] sm:$0xff] %vm18_vm1, %v128_v19 }

// kernel: gpt_decoder_layer.5
= control target key start
LH: loop header
LB: loop body
LE: loop exit
PB: predicated region body
PF: predicated region fallthrough
CT: control target
= control target key end

     0   :  { %s1066_s6 = smov 0   ;;  %s1068_s7 = smov 0   ;;  %s1175_s0 = inlined_call_operand.vmem [shape: f32[2,8,96], index: 0, kind: input, shape index: {}]   ;;  %s1176_s1 = inlined_call_operand.vmem [shape: f32[2,8,32], index: 1, kind: output, shape index: {}]  }
   0x1   :  { %s1070_s8 = smov 0  }
   0x2 LB: > { %s23_s9 = sadd.s32 1, %s1034_s7  ;;  %p887_p0 = scmp.ge.s32.totalorder %s1038_s8, 1  ;;  %s1038_s8 = sphi %s1070_s8, %s11_s8   ;;  %s1034_s7 = sphi %s1068_s7, %s1178_s7   ;;  %s1030_s6 = sphi %s1066_s6, %s1177_s6  }
   0x3   : > { %p25_p1 = scmp.ge.s32.totalorder %s23_s9, 2  ;;  %p100_p2 = scmp.lt.s32.totalorder %s1038_s8, 3 }
   0x5   : > { %s1180_s9 = smov (%p25_p1, %s23_s9), 0  ;;  %p101_p3 = pnand %p887_p0, %p100_p2 }
   0x6   : > { %p121_p4 = scmp.lt.s32.totalorder (!%p101_p3), %s1030_s6, 1  ;;  %v1040_v0 = vmov (!%p101_p3), 0.0   ;;  %vm1041_vm0 = vmmov (!%p101_p3), 0   ;;  %s1042_s14 = smov (!%p101_p3), 96   ;;  %vm136_vm1 = vcmask (!%p101_p3), 64512   ;;  %vm468_vm2 = vcmask (!%p101_p3), 130112  }
   0x7   : > { %104 = sbr.rel (%p101_p3) target bundleno = 1218 (0x4c2), region = 24  ;;  %920 = vmatprep.subr.mxu0 (!%p101_p3), %v1040_v0  ;;  %922 = vmatprep.mubr.msk.f32.mxu0 (!%p101_p3), %vm1041_vm0, %v1040_v0  ;;  %s1043_s15 = smov (!%p101_p3), 64   ;;  %vm639_vm3 = vcmask (!%p101_p3), 195712   ;;  %vm810_vm4 = vcmask (!%p101_p3), 261312  }
   0x8   : > { %925 = vmatprep.subr.mxu1 (!%p101_p3), %v1040_v0  ;;  %927 = vmatprep.mubr.msk.f32.mxu1 (!%p101_p3), %vm1041_vm0, %v1040_v0  ;;  %s1044_s16 = smov (!%p101_p3), 88   ;;  %s1045_s17 = smov (!%p101_p3), 120  }
   0x9   : > { %s1046_s18 = smov (!%p101_p3), 80   ;;  %s1047_s19 = smov (!%p101_p3), 112  }
   0xa   : > { %s1048_s20 = smov (!%p101_p3), 72   ;;  %s1049_s21 = smov (!%p101_p3), 104  }
   0xb   : > { %s1050_s22 = smov (!%p101_p3), 56   ;;  %s1051_s23 = smov (!%p101_p3), 48  }
   0xc   : > { %s1052_s24 = smov (!%p101_p3), 40   ;;  %s1053_s28 = smov (!%p101_p3), 8  }
   0xd   : > { %s1054_s29 = smov (!%p101_p3), 16   ;;  %s1055_s30 = smov (!%p101_p3), 24  }
   0xe   : > { %s1182_s6 = smov (!%p121_p4, %s1030_s6), 1 }
   0xf   : > { %s888_s10 = sshll.u32 %s1182_s6, 3 }
  0x10   : > { %s124_s13 = scalar_lea.vmem %s1175_s0, %s888_s10  ;;  %s1159_s27 = scalar_lea.vmem %s1176_s1, %s888_s10 }
  0x11   : > { %v1098_v1 = vld [vmem:[%s124_s13] sm:$0xff] }
  0x12   : > { %134 = vrot.lane.b32.xlu0 %v1098_v1, %s1042_s14  ;;  %220 = vrot.lane.b32.xlu1 %v1098_v1, %s1043_s15 }
  0x16   : > { %301 = vrot.lane.b32.xlu1 %v1098_v1, %s1044_s16 }
  0x1a   : > { %299 = vrot.lane.b32.xlu1 %v1098_v1, %s1045_s17 }
  0x1e   : > { %472 = vrot.lane.b32.xlu1 %v1098_v1, %s1046_s18 }
  0x22   : > { %470 = vrot.lane.b32.xlu1 %v1098_v1, %s1047_s19 }
  0x26   : > { %643 = vrot.lane.b32.xlu1 %v1098_v1, %s1048_s20 }
  0x2a   : > { %641 = vrot.lane.b32.xlu1 %v1098_v1, %s1049_s21 }
  0x84   : > { %v135_v2 = vpop.permute.xlu0 %134  ;;  %v221_v6 = vpop.permute.xlu1 %220 }
  0x85   : > { %921 = vmatpush3.xpose.msk.msra.mxu0 %vm136_vm1, %v135_v2  ;;  %926 = vmatpush3.msra.mxu1 %v221_v6 }
  0x86   : > { %935 = vmatprep.subr.mxu0 %v1040_v0  ;;  %930 = vmatprep.subr.mxu1 %v1040_v0 }
  0x88   : > { %923 = vmatmul.mubr.msk.f32.vlgmr.msra.gmra.mrb[0].mxu0 %vm136_vm1, %v1098_v1  ;;  %v302_v7 = vpop.permute.xlu1 %301 }
  0x89   : > { %937 = vmatprep.mubr.msk.f32.mxu0 %vm1041_vm0, %v1040_v0 }
  0x8c   : > { %v300_v10 = vpop.permute.xlu1 %299 }
  0x90   : > { %v473_v12 = vpop.permute.xlu1 %472 }
  0x94   : > { %v471_v13 = vpop.permute.xlu1 %470 }
  0x98   : > { %v644_v15 = vpop.permute.xlu1 %643 }
  0x9c   : > { %v642_v16 = vpop.permute.xlu1 %641 }
 0x15b   : > { %v207_v3 = vpop.f32.mrb[0].mxu0 }
 0x15c   : > { %v924_v4 = vpop.f32.mrb[1].mxu0  ;;  %v211_v5 = vsel %vm136_vm1, %v207_v3, -inf }
 0x15d   : > { %212 = vmax.xlane.f32.xlu0 %v211_v5 }
 0x173   : > { %386 = vrot.lane.b32.xlu0 %v1098_v1, %s1050_s22 }
 0x1ea   : > { %v213_v8 = vpop.xlane.xlu0 %212 }
 0x1eb   : > { %v214_v9 = vsub.f32 %v207_v3, %v213_v8 }
 0x1ed   : > { %v215_v11 = vmul.f32 1.442695, %v214_v9 }
 0x1ee   : > { %v387_v17 = vpop.permute.xlu0 %386 }
 0x1ef   : > { %1000 = vpow2.f32 %v215_v11  ;;  %936 = vmatpush3.msra.mxu0 %v387_v17 }
 0x1f0   : > { %945 = vmatprep.subr.mxu0 %v1040_v0 }
 0x1f9   : > { %v1117_v14 = vpop.eup %1000 }
 0x1fa   : > { %928 = vmatmul.mubr.msk.f32.vlgmr.msra.gmra.mrb[0].mxu1 %vm136_vm1, %v1117_v14  ;;  %v217_v46 = vsel %vm136_vm1, %v1117_v14, 0.0 }
 0x1fb   : > { %931 = vmatpush3.xpose.msk.msra.mxu1 %vm136_vm1, %v302_v7  ;;  %932 = vmatprep.mubr.msk.f32.mxu1 %vm1041_vm0, %v1040_v0 }
 0x1fc   : > { %940 = vmatprep.subr.mxu1 %v1040_v0 }
 0x1fe   : > { %933 = vmatmul.mubr.msk.f32.vlgmr.msra.gmra.mrb[2].mxu1 %vm136_vm1, %v300_v10 }
 0x1ff   : > { %941 = vmatpush3.xpose.msk.msra.mxu1 %vm136_vm1, %v473_v12  ;;  %942 = vmatprep.mubr.msk.f32.mxu1 %vm1041_vm0, %v1040_v0 }
 0x200   : > { %950 = vmatprep.subr.mxu1 %v1040_v0 }
 0x202   : > { %943 = vmatmul.mubr.msk.f32.vlgmr.msra.gmra.mrb[4].mxu1 %vm136_vm1, %v471_v13 }
 0x203   : > { %951 = vmatpush3.xpose.msk.msra.mxu1 %vm136_vm1, %v644_v15  ;;  %952 = vmatprep.mubr.msk.f32.mxu1 %vm1041_vm0, %v1040_v0 }
 0x206   : > { %953 = vmatmul.mubr.msk.f32.vlgmr.msra.gmra.mrb[6].mxu1 %vm136_vm1, %v642_v16 }
 0x2cd   : > { %v292_v18 = vpop.f32.mrb[0].mxu1 }
 0x2ce   : > { %v929_v19 = vpop.f32.mrb[1].mxu1 }
 0x2d1   : > { %v373_v20 = vpop.f32.mrb[2].mxu1 }
 0x2d2   : > { %v934_v21 = vpop.f32.mrb[3].mxu1  ;;  %v377_v22 = vsel %vm136_vm1, %v373_v20, -inf }
 0x2d3   : > { %378 = vmax.xlane.f32.xlu1 %v377_v22 }
 0x2d5   : > { %v544_v23 = vpop.f32.mrb[4].mxu1 }
 0x2d6   : > { %v944_v24 = vpop.f32.mrb[5].mxu1  ;;  %v548_v25 = vsel %vm136_vm1, %v544_v23, -inf }
 0x2d7   : > { %549 = vmax.xlane.f32.xlu0 %v548_v25 }
 0x2d9   : > { %v715_v26 = vpop.f32.mrb[6].mxu1 }
 0x2da   : > { %v954_v27 = vpop.f32.mrb[7].mxu1  ;;  %v719_v28 = vsel %vm136_vm1, %v715_v26, -inf }
 0x2db   : > { %720 = vmax.xlane.f32.xlu0 %v719_v28 }
 0x2e4   : > { %557 = vrot.lane.b32.xlu1 %v1098_v1, %s1051_s23 }
 0x2f1   : > { %728 = vrot.lane.b32.xlu0 %v1098_v1, %s1052_s24 }
 0x360   : > { %v379_v29 = vpop.xlane.xlu1 %378 }
 0x361   : > { %v380_v30 = vsub.f32 %v373_v20, %v379_v29 }
 0x363   : > { %v381_v31 = vmul.f32 1.442695, %v380_v30 }
 0x364   : > { %v550_v32 = vpop.xlane.xlu0 %549  ;;  %v558_v38 = vpop.permute.xlu1 %557 }
 0x365   : > { %1002 = vpow2.f32 %v381_v31  ;;  %v551_v33 = vsub.f32 %v544_v23, %v550_v32 }
 0x367   : > { %v552_v34 = vmul.f32 1.442695, %v551_v33 }
 0x368   : > { %v721_v35 = vpop.xlane.xlu0 %720 }
 0x369   : > { %1004 = vpow2.f32 %v552_v34  ;;  %v722_v36 = vsub.f32 %v715_v26, %v721_v35 }
 0x36b   : > { %v723_v37 = vmul.f32 1.442695, %v722_v36 }
 0x36c   : > { %v729_v41 = vpop.permute.xlu0 %728 }
 0x36d   : > { %1006 = vpow2.f32 %v723_v37 }
 0x36f   : > { %v1003_v39 = vpop.eup %1002 }
 0x370   : > { %938 = vmatmul.mubr.msk.f32.vlgmr.msra.gmra.mrb[2].mxu0 %vm136_vm1, %v1003_v39  ;;  %v383_v40 = vsel %vm136_vm1, %v1003_v39, 0.0 }
 0x371   : > { %946 = vmatpush3.msra.mxu0 %v558_v38  ;;  %384 = vadd.xlane.f32.xlu0 %v383_v40 }
 0x372   : > { %947 = vmatprep.mubr.msk.f32.mxu0 %vm1041_vm0, %v1040_v0  ;;  %955 = vmatprep.subr.mxu0 %v1040_v0 }
 0x373   : > { %v1005_v42 = vpop.eup %1004 }
 0x374   : > { %948 = vmatmul.mubr.msk.f32.vlgmr.msra.gmra.mrb[4].mxu0 %vm136_vm1, %v1005_v42  ;;  %v554_v43 = vsel %vm136_vm1, %v1005_v42, 0.0 }
 0x375   : > { %956 = vmatpush3.msra.mxu0 %v729_v41  ;;  %555 = vadd.xlane.f32.xlu1 %v554_v43 }
 0x376   : > { %957 = vmatprep.mubr.msk.f32.mxu0 %vm1041_vm0, %v1040_v0 }
 0x377   : > { %v1007_v44 = vpop.eup %1006 }
 0x378   : > { %958 = vmatmul.mubr.msk.f32.vlgmr.msra.gmra.mrb[6].mxu0 %vm136_vm1, %v1007_v44  ;;  %v725_v45 = vsel %vm136_vm1, %v1007_v44, 0.0 }
 0x379   : > { %726 = vadd.xlane.f32.xlu0 %v725_v45 }
 0x37d   : > { %218 = vadd.xlane.f32.xlu0 %v217_v46 }
 0x3fe   : > { %v385_v47 = vpop.xlane.xlu0 %384 }
 0x402   : > { %v556_v52 = vpop.xlane.xlu1 %555 }
 0x406   : > { %v727_v48 = vpop.xlane.xlu0 %726 }
 0x40a   : > { %v219_v49 = vpop.xlane.xlu0 %218 }
 0x40b   : > { %1008 = vrcp.f32 %v219_v49 }
 0x40c   : > { %1010 = vrcp.f32 %v385_v47 }
 0x40d   : > { %1012 = vrcp.f32 %v556_v52 }
 0x40e   : > { %1014 = vrcp.f32 %v727_v48 }
 0x415   : > { %v1009_v50 = vpop.eup %1008 }
 0x416   : > { %v297_v51 = vmul.f32 %v1009_v50, %v292_v18  ;;  %v1011_v53 = vpop.eup %1010 }
 0x417   : > { %v1013_v57 = vpop.eup %1012 }
 0x418   : > { %298 = vst.msk [vmem:[%s1159_s27] sm:$0xff] %vm136_vm1, %v297_v51  ;;  %v1015_v61 = vpop.eup %1014 }
 0x443   : > { %v458_v54 = vpop.f32.mrb[2].mxu0 }
 0x444   : > { %v463_v55 = vmul.f32 %v1011_v53, %v458_v54  ;;  %v939_v56 = vpop.f32.mrb[3].mxu0 }
 0x446   : > { %465 = vrot.lane.b32.xlu0 %v463_v55, %s1053_s28 }
 0x447   : > { %v629_v58 = vpop.f32.mrb[4].mxu0 }
 0x448   : > { %v634_v59 = vmul.f32 %v1013_v57, %v629_v58  ;;  %v949_v60 = vpop.f32.mrb[5].mxu0 }
 0x44a   : > { %636 = vrot.lane.b32.xlu1 %v634_v59, %s1054_s29 }
 0x44b   : > { %v800_v62 = vpop.f32.mrb[6].mxu0 }
 0x44c   : > { %v805_v63 = vmul.f32 %v1015_v61, %v800_v62  ;;  %v959_v0 = vpop.f32.mrb[7].mxu0 }
 0x44e   : > { %807 = vrot.lane.b32.xlu0 %v805_v63, %s1055_s30 }
 0x4b8   : > { %v466_v1 = vpop.permute.xlu0 %465 }
 0x4b9   : > { %469 = vst.msk [vmem:[%s1159_s27] sm:$0xff] %vm468_vm2, %v466_v1 }
 0x4bc   : > { %v637_v2 = vpop.permute.xlu1 %636 }
 0x4bd   : > { %640 = vst.msk [vmem:[%s1159_s27] sm:$0xff] %vm639_vm3, %v637_v2 }
 0x4c0   : > { %v808_v3 = vpop.permute.xlu0 %807 }
 0x4c1   : > { %811 = vst.msk [vmem:[%s1159_s27] sm:$0xff] %vm810_vm4, %v808_v3 }
 0x4c2 PF: > { %s11_s8 = sadd.s32 1, %s1038_s8   ;;  %s1177_s6 = smov %s1034_s7 }
 0x4c3   : > { %p8_p5 = scmp.ge.s32.totalorder %s11_s8, 4   ;;  %s1178_s7 = smov %s1180_s9 }
 0x4c5   :  { %10 = sbr.rel (!%p8_p5) target bundleno = 2 (0x2), region = 54 }

// kernel: gpt_decoder_layer.6
= control target key start
LH: loop header
LB: loop body
LE: loop exit
PB: predicated region body
PF: predicated region fallthrough
CT: control target
= control target key end

     0   :  { %vm27_vm0 = vcmask 261120   ;;  %v228_v3 = vmov 0.0   ;;  %s315_s1 = inlined_call_operand.vmem [shape: f32[32,32], index: 1, kind: input, shape index: {}]   ;;  %s316_s0 = inlined_call_operand.vmem [shape: f32[16,32], index: 0, kind: input, shape index: {}]   ;;  %s317_s2 = inlined_call_operand.vmem [shape: f32[1,32], index: 2, kind: input, shape index: {}]   ;;  %s318_s3 = inlined_call_operand.vmem [shape: f32[16,32], index: 3, kind: input, shape index: {}]   ;;  %s319_s4 = inlined_call_operand.vmem [shape: f32[1,32], index: 4, kind: input, shape index: {}]   ;;  %s320_s5 = inlined_call_operand.vmem [shape: f32[1,32], index: 5, kind: input, shape index: {}]   ;;  %s321_s6 = inlined_call_operand.vmem [shape: f32[16,32], index: 6, kind: output, shape index: {}]  }
   0x1   :  { %v34_v0 = vld [vmem:[%s315_s1] sm:$0xff]  ;;  %v35_v1 = vld [vmem:[%s315_s1 + $0x8] sm:$0xff]  ;;  %v36_v2 = vld [vmem:[%s315_s1 + $0x10] sm:$0xff]  ;;  %29 = vst.msk [vmem:[#allocation2 + $0x8] sm:$0xff] %vm27_vm0, %v228_v3 }
   0x2   :  { %28 = vst.msk [vmem:[#allocation2] sm:$0xff] %vm27_vm0, %v228_v3  ;;  %v215_v4 = vpack.c.bf16 %v35_v1, %v34_v0  ;;  %v37_v5 = vld [vmem:[%s315_s1 + $0x18] sm:$0xff]  ;;  %v32_v6 = vld [vmem:[%s316_s0] sm:$0xff]  ;;  %v33_v8 = vld [vmem:[%s316_s0 + $0x8] sm:$0xff] }
   0x3   :  { %v219_v7 = vpack.c.bf16 %v37_v5, %v36_v2  ;;  %212 = vmatprep.mubr.msk.f32.mxu0 %vm27_vm0, %v32_v6  ;;  %v195_v15 = vld [vmem:[%s317_s2] ss:$0 sm:$0xff]  ;;  %v139_v21 = vld [vmem:[%s318_s3 + $0x8] sm:$0xff] }
   0x4   :  { %216 = vmatprep.subr.bf16.mxu0 %v215_v4  ;;  %v138_v18 = vld [vmem:[%s318_s3] sm:$0xff] }
   0x5   :  { %218 = vmatpush3.bf16.msra.mxu0 %v215_v4  ;;  %v196_v43 = vld [vmem:[%s319_s4] ss:$0 sm:$0xff] }
   0x6   :  { %220 = vmatprep.subr.bf16.mxu0 %v219_v7  ;;  %v197_v45 = vld [vmem:[%s320_s5] ss:$0 sm:$0xff] }
   0x8   :  { %v31_v9 = vld [vmem:[#allocation2 + $0x8] sm:$0xff] }
   0x9   :  { %222 = vmatpush3.bf16.msra.mxu0 %v219_v7  ;;  %v30_v10 = vld [vmem:[#allocation2] sm:$0xff] }
   0xc   :  { %213 = vmatmul.mubr.msk.f32.vlgmr.msra.gmra.mrb[0].mxu0 %vm27_vm0, %v33_v8 }
  0xdf   :  { %v214_v11 = vpop.f32.mrb[0].mxu0 }
  0xe0   :  { %v121_v12 = vadd.f32 %v214_v11, %v31_v9  ;;  %v111_v13 = vpop.f32.mrb[1].mxu0 }
  0xe1   :  { %v120_v14 = vadd.f32 %v111_v13, %v30_v10 }
  0xe2   :  { %123 = vst.msk [vmem:[#allocation2 + $0x8] sm:$0xff] %vm27_vm0, %v121_v12 }
  0xe3   :  { %122 = vst.msk [vmem:[#allocation2] sm:$0xff] %vm27_vm0, %v120_v14 }
  0xe9   :  { %v128_v16 = vld [vmem:[#allocation2 + $0x8] sm:$0xff] }
  0xea   :  { %v127_v17 = vld [vmem:[#allocation2] sm:$0xff]  ;;  %v137_v20 = vadd.f32 %v195_v15, %v128_v16 }
  0xeb   :  { %v136_v19 = vadd.f32 %v195_v15, %v127_v17 }
  0xec   :  { %v141_v24 = vadd.f32 %v139_v21, %v137_v20 }
  0xed   :  { %v140_v22 = vadd.f32 %v138_v18, %v136_v19 }
  0xee   :  { %v145_v25 = vsel %vm27_vm0, %v141_v24, 0.0 }
  0xef   :  { %v142_v23 = vsel %vm27_vm0, %v140_v22, 0.0 }
  0xf0   :  { %143 = vadd.xlane.f32.xlu0 %v142_v23 }
  0xf4   :  { %146 = vadd.xlane.f32.xlu0 %v145_v25 }
 0x17d   :  { %v144_v26 = vpop.xlane.xlu0 %143 }
 0x17e   :  { %v149_v27 = vmul.f32 0.03125, %v144_v26 }
 0x180   :  { %v151_v28 = vsub.f32 %v140_v22, %v149_v27 }
 0x181   :  { %v147_v29 = vpop.xlane.xlu0 %146 }
 0x182   :  { %v150_v30 = vmul.f32 0.03125, %v147_v29  ;;  %v153_v31 = vmul.f32 %v151_v28, %v151_v28 }
 0x184   :  { %v152_v32 = vsub.f32 %v141_v24, %v150_v30  ;;  %v155_v33 = vsel %vm27_vm0, %v153_v31, 0.0 }
 0x185   :  { %156 = vadd.xlane.f32.xlu1 %v155_v33 }
 0x186   :  { %v154_v34 = vmul.f32 %v152_v32, %v152_v32 }
 0x188   :  { %v158_v35 = vsel %vm27_vm0, %v154_v34, 0.0 }
 0x189   :  { %159 = vadd.xlane.f32.xlu1 %v158_v35 }
 0x212   :  { %v157_v36 = vpop.xlane.xlu1 %156 }
 0x213   :  { %v161_v37 = vmul.f32 0.03125, %v157_v36 }
 0x215   :  { %v163_v38 = vadd.f32 1e-05, %v161_v37 }
 0x216   :  { %v160_v39 = vpop.xlane.xlu1 %159 }
 0x217   :  { %224 = vrsqrt.f32 %v163_v38  ;;  %v162_v40 = vmul.f32 0.03125, %v160_v39 }
 0x219   :  { %v164_v41 = vadd.f32 1e-05, %v162_v40 }
 0x21b   :  { %226 = vrsqrt.f32 %v164_v41 }
 0x221   :  { %v225_v42 = vpop.eup %224 }
 0x222   :  { %v167_v44 = vmul.f32 %v225_v42, %v151_v28 }
 0x224   :  { %v176_v46 = vmul.f32 %v196_v43, %v167_v44 }
 0x225   :  { %v227_v47 = vpop.eup %226 }
 0x226   :  { %v185_v48 = vadd.f32 %v197_v45, %v176_v46  ;;  %v168_v49 = vmul.f32 %v227_v47, %v152_v32 }
 0x228   :  { %187 = vst.msk [vmem:[%s321_s6] sm:$0xff] %vm27_vm0, %v185_v48  ;;  %v177_v50 = vmul.f32 %v196_v43, %v168_v49 }
 0x22a   :  { %v186_v51 = vadd.f32 %v197_v45, %v177_v50 }
 0x22c   :  { %188 = vst.msk [vmem:[%s321_s6 + $0x8] sm:$0xff] %vm27_vm0, %v186_v51 }

// kernel: gpt_decoder_layer.7
= control target key start
LH: loop header
LB: loop body
LE: loop exit
PB: predicated region body
PF: predicated region fallthrough
CT: control target
= control target key end

     0   :  { %vm30_vm0 = vcmask 261120   ;;  %v378_v20 = vmov 0.0   ;;  %vm140_vm1 = vcmask 523264   ;;  %s491_s1 = inlined_call_operand.vmem [shape: f32[32,64], index: 1, kind: input, shape index: {}]   ;;  %s492_s0 = inlined_call_operand.vmem [shape: f32[16,32], index: 0, kind: input, shape index: {}]   ;;  %s493_s3 = inlined_call_operand.vmem [shape: f32[64,32], index: 3, kind: input, shape index: {}]   ;;  %s494_s2 = inlined_call_operand.vmem [shape: f32[1,64], index: 2, kind: input, shape index: {}]   ;;  %s495_s4 = inlined_call_operand.vmem [shape: f32[1,32], index: 4, kind: input, shape index: {}]   ;;  %s496_s5 = inlined_call_operand.vmem [shape: f32[1,32], index: 5, kind: input, shape index: {}]   ;;  %s497_s6 = inlined_call_operand.vmem [shape: f32[1,32], index: 6, kind: input, shape index: {}]   ;;  %s498_s7 = inlined_call_operand.vmem [shape: f32[16,32], index: 7, kind: output, shape index: {}]  }
   0x1   :  { %v35_v0 = vld [vmem:[%s491_s1] sm:$0xff]  ;;  %v36_v1 = vld [vmem:[%s491_s1 + $0x8] sm:$0xff]  ;;  %v37_v2 = vld [vmem:[%s491_s1 + $0x10] sm:$0xff]  ;;  %32 = vst.msk [vmem:[#allocation2 + $0x8] sm:$0xff] %vm30_vm0, %v378_v20 }
   0x2   :  { %v349_v3 = vpack.c.bf16 %v36_v1, %v35_v0  ;;  %v38_v4 = vld [vmem:[%s491_s1 + $0x18] sm:$0xff]  ;;  %v33_v5 = vld [vmem:[%s492_s0] sm:$0xff]  ;;  %v133_v8 = vld [vmem:[%s493_s3 + $0x8] sm:$0xff]  ;;  %31 = vst.msk [vmem:[#allocation2] sm:$0xff] %vm30_vm0, %v378_v20 }
   0x3   :  { %v353_v6 = vpack.c.bf16 %v38_v4, %v37_v2  ;;  %327 = vmatprep.mubr.msk.f32.mxu0 %vm30_vm0, %v33_v5  ;;  %v132_v7 = vld [vmem:[%s493_s3] sm:$0xff]  ;;  %v134_v9 = vld [vmem:[%s493_s3 + $0x10] sm:$0xff]  ;;  %v135_v11 = vld [vmem:[%s493_s3 + $0x18] sm:$0xff] }
   0x4   :  { %350 = vmatprep.subr.bf16.mxu0 %v349_v3  ;;  %v357_v10 = vpack.c.bf16 %v133_v8, %v132_v7  ;;  %v361_v12 = vpack.c.bf16 %v135_v11, %v134_v9  ;;  %v136_v13 = vld [vmem:[%s493_s3 + $0x20] sm:$0xff]  ;;  %v137_v14 = vld [vmem:[%s493_s3 + $0x28] sm:$0xff]  ;;  %v138_v17 = vld [vmem:[%s493_s3 + $0x30] sm:$0xff] }
   0x5   :  { %352 = vmatpush3.bf16.msra.mxu0 %v349_v3  ;;  %v365_v15 = vpack.c.bf16 %v137_v14, %v136_v13  ;;  %v34_v16 = vld [vmem:[%s492_s0 + $0x8] sm:$0xff]  ;;  %v139_v18 = vld [vmem:[%s493_s3 + $0x38] sm:$0xff]  ;;  %v295_v21 = vld [vmem:[%s494_s2] ss:$0 sm:$0xff] }
   0x6   :  { %354 = vmatprep.subr.bf16.mxu0 %v353_v6  ;;  %358 = vmatprep.subr.bf16.mxu1 %v357_v10  ;;  %v369_v19 = vpack.c.bf16 %v139_v18, %v138_v17  ;;  %v300_v34 = vld [vmem:[%s495_s4] ss:$0 sm:$0xff] }
   0x7   :  { %360 = vmatpush3.bf16.msra.mxu1 %v357_v10  ;;  %v301_v60 = vld [vmem:[%s496_s5] ss:$0 sm:$0xff] }
   0x8   :  { %362 = vmatprep.subr.bf16.mxu1 %v361_v12  ;;  %v131_v28 = vld [vmem:[#allocation2 + $0x8] sm:$0xff]  ;;  %v302_v62 = vld [vmem:[%s497_s6] ss:$0 sm:$0xff] }
   0x9   :  { %356 = vmatpush3.bf16.msra.mxu0 %v353_v6  ;;  %v130_v29 = vld [vmem:[#allocation2] sm:$0xff] }
   0xb   :  { %364 = vmatpush3.bf16.msra.mxu1 %v361_v12 }
   0xc   :  { %328 = vmatmul.mubr.msk.f32.vlgmr.msra.gmra.mrb[0].mxu0 %vm30_vm0, %v34_v16  ;;  %366 = vmatprep.subr.bf16.mxu1 %v365_v15 }
   0xf   :  { %368 = vmatpush3.bf16.msra.mxu1 %v365_v15 }
  0x10   :  { %370 = vmatprep.subr.bf16.mxu1 %v369_v19 }
  0x13   :  { %372 = vmatpush3.bf16.msra.mxu1 %v369_v19 }
  0xdf   :  { %v329_v22 = vpop.f32.mrb[0].mxu0 }
  0xe0   :  { %v125_v23 = vadd.f32 %v329_v22, %v295_v21  ;;  %v119_v24 = vpop.f32.mrb[1].mxu0 }
  0xe1   :  { %v120_v25 = vadd.f32 %v295_v21, %v119_v24 }
  0xe2   :  { %v129_v27 = vmax.f32 %v125_v23, 0.0 }
  0xe3   :  { %v128_v26 = vmax.f32 %v120_v25, 0.0 }
  0xe5   :  { %346 = vmatprep.mubr.msk.f32.mxu1 %vm140_vm1, %v128_v26 }
  0xe6   :  { %347 = vmatmul.mubr.msk.f32.vlgmr.msra.gmra.mrb[0].mxu1 %vm140_vm1, %v129_v27 }
 0x1b9   :  { %v348_v30 = vpop.f32.mrb[0].mxu1 }
 0x1ba   :  { %v223_v31 = vadd.f32 %v348_v30, %v131_v28  ;;  %v213_v32 = vpop.f32.mrb[1].mxu1 }
 0x1bb   :  { %v222_v33 = vadd.f32 %v213_v32, %v130_v29 }
 0x1bc   :  { %225 = vst.msk [vmem:[#allocation2 + $0x8] sm:$0xff] %vm30_vm0, %v223_v31 }
 0x1bd   :  { %224 = vst.msk [vmem:[#allocation2] sm:$0xff] %vm30_vm0, %v222_v33 }
 0x1c3   :  { %v230_v35 = vld [vmem:[#allocation2 + $0x8] sm:$0xff] }
 0x1c4   :  { %v229_v36 = vld [vmem:[#allocation2] sm:$0xff]  ;;  %v239_v38 = vadd.f32 %v300_v34, %v230_v35 }
 0x1c5   :  { %v238_v37 = vadd.f32 %v300_v34, %v229_v36 }
 0x1c6   :  { %v243_v41 = vadd.f32 %v239_v38, %v34_v16 }
 0x1c7   :  { %v242_v39 = vadd.f32 %v238_v37, %v33_v5 }
 0x1c8   :  { %v247_v42 = vsel %vm30_vm0, %v243_v41, 0.0 }
 0x1c9   :  { %v244_v40 = vsel %vm30_vm0, %v242_v39, 0.0 }
 0x1ca   :  { %245 = vadd.xlane.f32.xlu0 %v244_v40 }
 0x1ce   :  { %248 = vadd.xlane.f32.xlu0 %v247_v42 }
 0x257   :  { %v246_v43 = vpop.xlane.xlu0 %245 }
 0x258   :  { %v251_v44 = vmul.f32 0.03125, %v246_v43 }
 0x25a   :  { %v253_v45 = vsub.f32 %v242_v39, %v251_v44 }
 0x25b   :  { %v249_v46 = vpop.xlane.xlu0 %248 }
 0x25c   :  { %v252_v47 = vmul.f32 0.03125, %v249_v46  ;;  %v255_v48 = vmul.f32 %v253_v45, %v253_v45 }
 0x25e   :  { %v254_v49 = vsub.f32 %v243_v41, %v252_v47  ;;  %v257_v50 = vsel %vm30_vm0, %v255_v48, 0.0 }
 0x25f   :  { %258 = vadd.xlane.f32.xlu1 %v257_v50 }
 0x260   :  { %v256_v51 = vmul.f32 %v254_v49, %v254_v49 }
 0x262   :  { %v260_v52 = vsel %vm30_vm0, %v256_v51, 0.0 }
 0x263   :  { %261 = vadd.xlane.f32.xlu1 %v260_v52 }
 0x2ec   :  { %v259_v53 = vpop.xlane.xlu1 %258 }
 0x2ed   :  { %v263_v54 = vmul.f32 0.03125, %v259_v53 }
 0x2ef   :  { %v265_v55 = vadd.f32 1e-05, %v263_v54 }
 0x2f0   :  { %v262_v56 = vpop.xlane.xlu1 %261 }
 0x2f1   :  { %374 = vrsqrt.f32 %v265_v55  ;;  %v264_v57 = vmul.f32 0.03125, %v262_v56 }
 0x2f3   :  { %v266_v58 = vadd.f32 1e-05, %v264_v57 }
 0x2f5   :  { %376 = vrsqrt.f32 %v266_v58 }
 0x2fb   :  { %v375_v59 = vpop.eup %374 }
 0x2fc   :  { %v269_v61 = vmul.f32 %v375_v59, %v253_v45 }
 0x2fe   :  { %v278_v63 = vmul.f32 %v301_v60, %v269_v61 }
 0x2ff   :  { %v377_v0 = vpop.eup %376 }
 0x300   :  { %v287_v1 = vadd.f32 %v302_v62, %v278_v63  ;;  %v270_v2 = vmul.f32 %v377_v0, %v254_v49 }
 0x302   :  { %289 = vst.msk [vmem:[%s498_s7] sm:$0xff] %vm30_vm0, %v287_v1  ;;  %v279_v3 = vmul.f32 %v301_v60, %v270_v2 }
 0x304   :  { %v288_v4 = vadd.f32 %v302_v62, %v279_v3 }
 0x306   :  { %290 = vst.msk [vmem:[%s498_s7 + $0x8] sm:$0xff] %vm30_vm0, %v288_v4 }

</bundles_post_ra>
